<compile_context>
chip_gen: v5e
topology: v5e:2x2
jax: 0.10.0
libtpu: 0.0.40
codegen_flags: <defaults>
</compile_context>

<pallas_src>
import functools

import jax
import jax.numpy as jnp
from jax.experimental import pallas as pl
from jax.experimental.pallas import tpu as pltpu


def _round_up(x, m):
    return ((x + m - 1) // m) * m


def _smooth_loss_kernel(logits_ref, target_ref, o_ref, *,
                        epsilon, classes, n_total, block_samples):
    i = pl.program_id(0)

    x = logits_ref[...].astype(jnp.float32)          # (C, bs, 128)
    tgt = target_ref[...]                            # (bs, 128) int32
    c, bs, lanes = x.shape

    # Stable log-softmax pieces. axis=0 is a *leading* axis -> elementwise
    # VPU combines over the C slices; exp/log go to the EUP.
    m = jnp.max(x, axis=0)                           # (bs, 128)
    shifted = x - m[None]                            # (C, bs, 128)
    sumexp = jnp.sum(jnp.exp(shifted), axis=0)       # (bs, 128)
    lse = jnp.log(sumexp)                            # (bs, 128)

    # Fused smoothing weights: (1-eps)+eps/C on the target class, eps/C else.
    base = epsilon / classes
    cls = jax.lax.broadcasted_iota(jnp.int32, (c, bs, lanes), 0)
    w = jnp.where(cls == tgt[None], 1.0 - epsilon + base, base)   # (C, bs, 128)
    wsum = jnp.sum(w * shifted, axis=0)              # (bs, 128) single reduction

    per_sample = lse - wsum                          # (bs, 128)

    # Mask samples past the true batch size (padded tail of the last block).
    row = jax.lax.broadcasted_iota(jnp.int32, (bs, lanes), 0)
    lane = jax.lax.broadcasted_iota(jnp.int32, (bs, lanes), 1)
    sid = i * block_samples + row * lanes + lane
    o_ref[...] = jnp.where(sid < n_total, per_sample, 0.0)


def _pick_block_rows(c, logit_itemsize):
    """Rows of 128 samples per block, from exact (lane-dense) VMEM byte math."""
    # Per 128-sample row, double-buffered DMA blocks:
    #   logits c*128*itemsize, targets 128*4, output 128*4
    # plus ~4 live f32 (c, ., 128) temporaries for the elementwise chain
    # (cast / shifted / exp / weights) that may spill to VMEM.
    per_row = 2 * (c * 128 * logit_itemsize + 128 * 4 + 128 * 4) + 4 * c * 128 * 4
    budget = 24 * 1024 * 1024                 # stays well under the 32 MiB limit set below
    cap = budget // per_row
    return max(8, min(512, (cap // 8) * 8))


def _smooth_loss_xla(output, target, epsilon, classes):
    """Plain-XLA path for small batches (kernel dispatch would dominate)."""
    logp = jax.nn.log_softmax(output.astype(jnp.float32), axis=1)
    onehot = jax.nn.one_hot(target, classes, dtype=jnp.float32)
    smoothed = (1.0 - epsilon) * onehot + epsilon / classes
    return jnp.mean(jnp.sum(-smoothed * logp, axis=1))


def smooth_loss(output, target, *, epsilon=0.1, classes=9,
                block_rows=None, use_kernel=None):
    """output: (N, C) float logits, target: (N,) int labels -> scalar f32 loss."""
    n, c = output.shape
    assert c == classes

    if use_kernel is None:
        use_kernel = n >= 2048          # tiny batches: kernel launch is pure overhead
    if not use_kernel:
        return _smooth_loss_xla(output, target, epsilon, classes)

    rows = -(-n // 128)                               # 128-sample rows
    bs_cap = block_rows if block_rows is not None else _pick_block_rows(
        c, jnp.dtype(output.dtype).itemsize)
    bs_cap = max(8, (int(bs_cap) // 8) * 8)

    if rows <= bs_cap:
        num_blocks, bs = 1, rows                      # single full-extent block
    else:
        num_blocks = -(-rows // bs_cap)
        bs = _round_up(-(-rows // num_blocks), 8)     # balanced, multiple of 8
    rows_pad = num_blocks * bs
    n_pad = rows_pad * 128

    # Class-major, lane-dense layout (one relayout pass; see TODO at top).
    x = jnp.transpose(output, (1, 0))                 # (C, N)
    x = jnp.pad(x, ((0, 0), (0, n_pad - n)))
    x = x.reshape(c, rows_pad, 128)
    t = jnp.pad(target.astype(jnp.int32), (0, n_pad - n)).reshape(rows_pad, 128)

    kernel = functools.partial(
        _smooth_loss_kernel,
        epsilon=float(epsilon), classes=int(classes),
        n_total=int(n), block_samples=int(bs * 128),
    )

    per_sample = pl.pallas_call(
        kernel,
        out_shape=jax.ShapeDtypeStruct((rows_pad, 128), jnp.float32),
        grid=(num_blocks,),
        in_specs=[
            pl.BlockSpec((c, bs, 128), lambda i: (0, i, 0)),   # logits block
            pl.BlockSpec((bs, 128), lambda i: (i, 0)),         # target block
        ],
        out_specs=pl.BlockSpec((bs, 128), lambda i: (i, 0)),   # per-sample losses
        compiler_params=pltpu.CompilerParams(
            dimension_semantics=("parallel",),      # no carried state -> 2 TCs on v7x
            vmem_limit_bytes=32 * 1024 * 1024,
        ),
    )(x, t)

    # Padded samples were zeroed in-kernel; divide by the true N.
    return jnp.sum(per_sample) * jnp.float32(1.0 / n)


def smooth_loss_ref(output, target, *, epsilon=0.1, classes=9):
    """Pure-JAX reference mirroring the PyTorch module."""
    return _smooth_loss_xla(output, target, epsilon, classes)


if __name__ == "__main__":
    key = jax.random.PRNGKey(0)
    k1, k2, k3, k4 = jax.random.split(key, 4)

    # Shipped shape: batch=8, classes=9 (module default). Force the kernel
    # path (single block, heavy tail masking).
    N, C = 8, 9
    logits = jax.random.normal(k1, (N, C), dtype=jnp.float32)
    labels = jax.random.randint(k2, (N,), 0, C, dtype=jnp.int32)
    loss = jax.block_until_ready(
        smooth_loss(logits, labels, epsilon=0.1, classes=C, use_kernel=True))
    ref = smooth_loss_ref(logits, labels, epsilon=0.1, classes=C)
    assert jnp.allclose(loss, ref, atol=1e-5, rtol=1e-5), (loss, ref)

    # Auto-routing for the tiny shape (XLA fallback) must also match.
    loss_auto = jax.block_until_ready(
        smooth_loss(logits, labels, epsilon=0.1, classes=C))
    assert jnp.allclose(loss_auto, ref, atol=1e-5, rtol=1e-5), (loss_auto, ref)

    # Larger, non-multiple-of-block batch: exercises grid > 1, the "parallel"
    # batch axis, lane-dense blocks, and masking of the padded last block.
    N2 = 2500
    logits2 = jax.random.normal(k3, (N2, C), dtype=jnp.float32)
    labels2 = jax.random.randint(k4, (N2,), 0, C, dtype=jnp.int32)
    loss2 = jax.block_until_ready(
        smooth_loss(logits2, labels2, epsilon=0.1, classes=C,
                    block_rows=8, use_kernel=True))
    ref2 = smooth_loss_ref(logits2, labels2, epsilon=0.1, classes=C)
    assert jnp.allclose(loss2, ref2, atol=1e-5, rtol=1e-4), (loss2, ref2)

    print("KERNEL_OK")
</pallas_src>

<mosaic_0001>
module attributes {stable_mosaic.version = 11 : i64} {
  func.func @_smooth_loss_kernel(%arg0: i32, %arg1: memref<9x1x128xf32, #tpu.memory_space<vmem>>, %arg2: memref<1x128xi32, #tpu.memory_space<vmem>>, %arg3: memref<1x128xf32, #tpu.memory_space<vmem>>) attributes {dimension_semantics = [#tpu.dimension_semantics<parallel>], iteration_bounds = array<i64: 1>, scalar_prefetch = 0 : i64, scratch_operands = 0 : i64, tpu.core_type = #tpu.core_type<tc>, window_params = [{transform_indices = @transform_0, window_bounds = array<i64: 9, 1, 128>}, {transform_indices = @transform_1, window_bounds = array<i64: 1, 128>}, {transform_indices = @transform_2, window_bounds = array<i64: 1, 128>}]} {
    %c0 = arith.constant 0 : index
    %c0_0 = arith.constant 0 : index
    %c0_1 = arith.constant 0 : index
    %0 = vector.load %arg1[%c0, %c0_0, %c0_1] : memref<9x1x128xf32, #tpu.memory_space<vmem>>, vector<9x1x128xf32>
    %c0_2 = arith.constant 0 : index
    %c0_3 = arith.constant 0 : index
    %1 = vector.load %arg2[%c0_2, %c0_3] : memref<1x128xi32, #tpu.memory_space<vmem>>, vector<1x128xi32>
    %cst = arith.constant dense<0xFF800000> : vector<1x128xf32>
    %2 = vector.multi_reduction <maximumf>, %0, %cst [0] : vector<9x1x128xf32> to vector<1x128xf32>
    %3 = vector.shape_cast %2 : vector<1x128xf32> to vector<1x1x128xf32>
    %4 = vector.broadcast %3 : vector<1x1x128xf32> to vector<9x1x128xf32>
    %5 = arith.subf %0, %4 : vector<9x1x128xf32>
    %6 = math.exp %5 : vector<9x1x128xf32>
    %cst_4 = arith.constant dense<0.000000e+00> : vector<1x128xf32>
    %7 = vector.multi_reduction <add>, %6, %cst_4 [0] : vector<9x1x128xf32> to vector<1x128xf32>
    %8 = math.log %7 : vector<1x128xf32>
    %9 = tpu.iota {dimensions = array<i32: 0>} : vector<9x1x128xi32>
    %10 = vector.shape_cast %1 : vector<1x128xi32> to vector<1x1x128xi32>
    %11 = vector.broadcast %10 : vector<1x1x128xi32> to vector<9x1x128xi32>
    %12 = arith.cmpi eq, %9, %11 : vector<9x1x128xi32>
    %cst_5 = arith.constant 0.911111116 : f32
    %cst_6 = arith.constant 0.0111111114 : f32
    %13 = vector.broadcast %cst_5 : f32 to vector<9x1x128xf32>
    %14 = vector.broadcast %cst_6 : f32 to vector<9x1x128xf32>
    %15 = arith.select %12, %13, %14 : vector<9x1x128xi1>, vector<9x1x128xf32>
    %16 = arith.mulf %15, %5 : vector<9x1x128xf32>
    %cst_7 = arith.constant dense<0.000000e+00> : vector<1x128xf32>
    %17 = vector.multi_reduction <add>, %16, %cst_7 [0] : vector<9x1x128xf32> to vector<1x128xf32>
    %18 = arith.subf %8, %17 : vector<1x128xf32>
    %19 = tpu.iota {dimensions = array<i32: 0>} : vector<1x128xi32>
    %20 = tpu.iota {dimensions = array<i32: 1>} : vector<1x128xi32>
    %c128_i32 = arith.constant 128 : i32
    %21 = arith.muli %arg0, %c128_i32 : i32
    %c128_i32_8 = arith.constant 128 : i32
    %22 = vector.broadcast %c128_i32_8 : i32 to vector<1x128xi32>
    %23 = arith.muli %19, %22 : vector<1x128xi32>
    %24 = vector.broadcast %21 : i32 to vector<1x128xi32>
    %25 = arith.addi %24, %23 : vector<1x128xi32>
    %26 = arith.addi %25, %20 : vector<1x128xi32>
    %c8_i32 = arith.constant 8 : i32
    %27 = vector.broadcast %c8_i32 : i32 to vector<1x128xi32>
    %28 = arith.cmpi slt, %26, %27 : vector<1x128xi32>
    %cst_9 = arith.constant 0.000000e+00 : f32
    %29 = vector.broadcast %cst_9 : f32 to vector<1x128xf32>
    %30 = arith.select %28, %18, %29 : vector<1x128xi1>, vector<1x128xf32>
    %c0_10 = arith.constant 0 : index
    %c0_11 = arith.constant 0 : index
    %31 = vector.load %arg3[%c0_10, %c0_11] : memref<1x128xf32, #tpu.memory_space<vmem>>, vector<1x128xf32>
    tpu.vector_store %arg3[%c0_10, %c0_11], %30 {strides = array<i32>} : memref<1x128xf32, #tpu.memory_space<vmem>>, vector<1x128xf32>,
    return
  }
  func.func @transform_0(%arg0: i32) -> (i32, i32, i32) {
    %c0_i32 = arith.constant 0 : i32
    %c0_i32_0 = arith.constant 0 : i32
    %c0_i32_1 = arith.constant 0 : i32
    return %c0_i32, %arg0, %c0_i32_0 : i32, i32, i32
  }
  func.func @transform_1(%arg0: i32) -> (i32, i32) {
    %c0_i32 = arith.constant 0 : i32
    %c0_i32_0 = arith.constant 0 : i32
    return %arg0, %c0_i32 : i32, i32
  }
  func.func @transform_2(%arg0: i32) -> (i32, i32) {
    %c0_i32 = arith.constant 0 : i32
    %c0_i32_0 = arith.constant 0 : i32
    return %arg0, %c0_i32 : i32, i32
  }
}

</mosaic_0001>

<bundles_post_ra>
// kernel: tpu_custom_call.1
= control target key start
LH: loop header
LB: loop body
LE: loop exit
PB: predicated region body
PF: predicated region fallthrough
CT: control target
= control target key end

     0   :  { %7 = vsyncpa [#allocation3], 0  ;;  %s402_s0 = inlined_call_operand.hbm [shape: f32[9,1,128], index: 0, kind: input, shape index: {}]   ;;  %s403_s1 = inlined_call_operand.hbm [shape: s32[1,128], index: 1, kind: input, shape index: {}]   ;;  %s404_s2 = inlined_call_operand.hbm [shape: f32[1,128], index: 2, kind: output, shape index: {}]  }
   0x1   :  { %8 = vsyncpa [#allocation6], 0 }
   0x2   :  { %9 = vsyncpa [#allocation4], 0  ;;  %s14_s11 = sshll.u32 %s402_s0, 4  ;;  %s299_s12 = smov [#allocation2]   ;;  %s15_s11 = int_to_ptr.hbm [resolvable:$true] %s14_s11 }
   0x3   :  { %s16_s13 = sshll.u32 %s299_s12, 4  ;;  %s28_s16 = sshll.u32 %s403_s1, 4  ;;  %s17_s13 = int_to_ptr.vmem [resolvable:$true] %s16_s13  ;;  %s29_s16 = int_to_ptr.hbm [resolvable:$true] %s28_s16 }
   0x4   :  { %s300_s17 = smov 16   ;;  %s301_s18 = smov 1  }
   0x5   :  { %22 = dma.hbm_to_vmem [thread:$0]  %s15_s11, 144, %s17_s13, [#allocation3], %s300_s17, %s300_s17, %s301_s18  }
   0x6   :  { %s302_s19 = smov [#allocation5]  }
   0x7   :  { %s30_s20 = sshll.u32 %s302_s19, 4  ;;  %s31_s20 = int_to_ptr.vmem [resolvable:$true] %s30_s20 }
   0x8   :  { %33 = dma.hbm_to_vmem [thread:$0]  %s29_s16, 16, %s31_s20, [#allocation6]  }
   0x9   :  { %293 = dma.done.wait [#allocation3], 144  }
   0xa   :  { %294 = vsyncadd [#allocation3], 4294967152 }
   0xb   :  { %295 = dma.done.wait [#allocation6], 16  }
   0xc   :  { %296 = vsyncadd [#allocation6], 4294967280  ;;  %v52_v0 = vlaneseq  ;;  %v42_v2 = vld [vmem:[#allocation2] sm:$0x1]  ;;  %v43_v3 = vld [vmem:[#allocation2 + $0x1] sm:$0x1] }
   0xd   :  { %v44_v4 = vld [vmem:[#allocation2 + $0x2] sm:$0x1]  ;;  %v45_v5 = vld [vmem:[#allocation2 + $0x3] sm:$0x1]  ;;  %v46_v6 = vld [vmem:[#allocation2 + $0x4] sm:$0x1] }
   0xe   :  { %vm327_vm0 = vcmp.lt.s32.totalorder %v52_v0, 128  ;;  %v47_v7 = vld [vmem:[#allocation2 + $0x5] sm:$0x1]  ;;  %v48_v8 = vld [vmem:[#allocation2 + $0x6] sm:$0x1]  ;;  %vm100_vm6 = vcmask 1040384  }
   0xf   :  { %v49_v9 = vld [vmem:[#allocation2 + $0x7] sm:$0x1]  ;;  %v50_v10 = vld [vmem:[#allocation2 + $0x8] sm:$0x1]  ;;  %v56_v11 = vsel %vm327_vm0, %v42_v2, -inf  ;;  %v57_v12 = vsel %vm327_vm0, %v43_v3, -inf }
  0x10   :  { %v58_v13 = vsel %vm327_vm0, %v44_v4, -inf  ;;  %v59_v14 = vsel %vm327_vm0, %v45_v5, -inf  ;;  %v60_v15 = vsel %vm327_vm0, %v46_v6, -inf  ;;  %v62_v16 = vsel %vm327_vm0, %v47_v7, -inf  ;;  %v347_v23 = vld [vmem:[#allocation5] sm:$0x1] }
  0x11   :  { %v64_v17 = vsel %vm327_vm0, %v48_v8, -inf  ;;  %v66_v18 = vsel %vm327_vm0, %v49_v9, -inf  ;;  %v61_v19 = vmax.f32 %v56_v11, %v60_v15  ;;  %v63_v20 = vmax.f32 %v57_v12, %v62_v16  ;;  %s304_s0 = smov [#allocation7]   ;;  %s184_s23 = sshll.u32 %s404_s2, 4  ;;  %s185_s23 = int_to_ptr.hbm [resolvable:$true] %s184_s23 }
  0x12   :  { %v65_v21 = vmax.f32 %v58_v13, %v64_v17  ;;  %v67_v22 = vmax.f32 %v59_v14, %v66_v18  ;;  %v68_v24 = vsel %vm327_vm0, %v50_v10, -inf  ;;  %vm120_vm1 = vcmp.eq.s32.totalorder %v347_v23, 0  ;;  %s182_s1 = sshll.u32 %s304_s0, 4  ;;  %s183_s1 = int_to_ptr.vmem [resolvable:$true] %s182_s1 }
  0x13   :  { %v69_v25 = vmax.f32 %v61_v19, %v68_v24  ;;  %vm121_vm2 = vcmp.eq.s32.totalorder %v347_v23, 1  ;;  %vm122_vm3 = vcmp.eq.s32.totalorder %v347_v23, 2  ;;  %vm123_vm4 = vcmp.eq.s32.totalorder %v347_v23, 3 }
  0x14   :  { %v71_v26 = vmax.f32 %v65_v21, %v67_v22  ;;  %v303_v29 = vmov 0.011111111   ;;  %vm124_vm5 = vcmp.eq.s32.totalorder %v347_v23, 4  ;;  %vm125_vm7 = vcmp.eq.s32.totalorder %v347_v23, 5 }
  0x15   :  { %v70_v27 = vmax.f32 %v69_v25, %v63_v20  ;;  %v129_v30 = vsel %vm120_vm1, 0.9111111, %v303_v29  ;;  %v130_v37 = vsel %vm121_vm2, 0.9111111, %v303_v29  ;;  %v131_v38 = vsel %vm122_vm3, 0.9111111, %v303_v29 }
  0x16   :  { %v132_v44 = vsel %vm123_vm4, 0.9111111, %v303_v29  ;;  %v133_v53 = vsel %vm124_vm5, 0.9111111, %v303_v29  ;;  %vm126_vm8 = vcmp.eq.s32.totalorder %v347_v23, 6  ;;  %vm127_vm9 = vcmp.eq.s32.totalorder %v347_v23, 7 }
  0x17   :  { %v72_v28 = vmax.f32 %v70_v27, %v71_v26  ;;  %v135_v18 = vsel %vm126_vm8, 0.9111111, %v303_v29  ;;  %vm128_vm10 = vcmp.eq.s32.totalorder %v347_v23, 8 }
  0x19   :  { %v73_v31 = vsub.f32 %v42_v2, %v72_v28  ;;  %v74_v32 = vsub.f32 %v43_v3, %v72_v28  ;;  %v75_v33 = vsub.f32 %v44_v4, %v72_v28  ;;  %v76_v34 = vsub.f32 %v45_v5, %v72_v28 }
  0x1a   :  { %v77_v35 = vsub.f32 %v46_v6, %v72_v28  ;;  %v78_v36 = vsub.f32 %v47_v7, %v72_v28  ;;  %v79_v42 = vsub.f32 %v48_v8, %v72_v28  ;;  %v362_v45 = vsub.f32 %v49_v9, %v72_v28 }
  0x1b   :  { %v82_v39 = vmul.f32 1.442695, %v73_v31  ;;  %v84_v40 = vmul.f32 1.442695, %v74_v32  ;;  %v86_v41 = vmul.f32 1.442695, %v75_v33  ;;  %v138_v47 = vmul.f32 %v129_v30, %v73_v31 }
  0x1c   :  { %v88_v43 = vmul.f32 1.442695, %v76_v34  ;;  %v90_v46 = vmul.f32 1.442695, %v77_v35  ;;  %v92_v48 = vmul.f32 1.442695, %v78_v36  ;;  %v139_v49 = vmul.f32 %v130_v37, %v74_v32 }
  0x1d   :  { %201 = vpow2.f32 %v82_v39  ;;  %v140_v50 = vmul.f32 %v131_v38, %v75_v33  ;;  %v364_v51 = vsub.f32 %v50_v10, %v72_v28  ;;  %v94_v52 = vmul.f32 1.442695, %v79_v42 }
  0x1e   :  { %203 = vpow2.f32 %v84_v40  ;;  %v141_v54 = vmul.f32 %v132_v44, %v76_v34  ;;  %v147_v55 = vsel %vm100_vm6, %v138_v47, 0.0  ;;  %v148_v56 = vsel %vm100_vm6, %v139_v49, 0.0 }
  0x1f   :  { %205 = vpow2.f32 %v86_v41  ;;  %v150_v57 = vsel %vm100_vm6, %v140_v50, 0.0  ;;  %v96_v58 = vmul.f32 1.442695, %v362_v45  ;;  %v149_v59 = vadd.f32 %v148_v56, %v147_v55 }
  0x20   :  { %207 = vpow2.f32 %v88_v43  ;;  %v98_v61 = vmul.f32 1.442695, %v364_v51  ;;  %v142_v62 = vmul.f32 %v133_v53, %v77_v35  ;;  %v152_v3 = vsel %vm100_vm6, %v141_v54, 0.0 }
  0x21   :  { %209 = vpow2.f32 %v90_v46  ;;  %v151_v2 = vadd.f32 %v150_v57, %v149_v59  ;;  %v134_v6 = vsel %vm125_vm7, 0.9111111, %v303_v29  ;;  %v144_v26 = vmul.f32 %v135_v18, %v79_v42 }
  0x22   :  { %211 = vpow2.f32 %v92_v48  ;;  %v143_v15 = vmul.f32 %v134_v6, %v78_v36  ;;  %v154_v16 = vsel %vm100_vm6, %v142_v62, 0.0  ;;  %v136_v30 = vsel %vm127_vm9, 0.9111111, %v303_v29 }
  0x23   :  { %v202_v60 = vpop.eup %201  ;;  %213 = vpow2.f32 %v94_v52  ;;  %v153_v12 = vadd.f32 %v152_v3, %v151_v2  ;;  %v145_v36 = vmul.f32 %v136_v30, %v362_v45  ;;  %v158_v37 = vsel %vm100_vm6, %v144_v26, 0.0 }
  0x24   :  { %v204_v63 = vpop.eup %203  ;;  %v101_v1 = vsel %vm100_vm6, %v202_v60, 0.0  ;;  %215 = vpow2.f32 %v96_v58  ;;  %v156_v27 = vsel %vm100_vm6, %v143_v15, 0.0  ;;  %v137_v39 = vsel %vm128_vm10, 0.9111111, %v303_v29 }
  0x25   :  { %v206_v4 = vpop.eup %205  ;;  %v102_v5 = vsel %vm100_vm6, %v204_v63, 0.0  ;;  %217 = vpow2.f32 %v98_v61  ;;  %v155_v22 = vadd.f32 %v154_v16, %v153_v12  ;;  %v166_v41 = vshrl.u32 %v52_v0, 7 }
  0x26   :  { %v208_v7 = vpop.eup %207  ;;  %v103_v8 = vadd.f32 %v102_v5, %v101_v1  ;;  %v104_v9 = vsel %vm100_vm6, %v206_v4, 0.0  ;;  %v146_v44 = vmul.f32 %v137_v39, %v364_v51  ;;  %v160_v23 = vsel %vm100_vm6, %v145_v36, 0.0 }
  0x27   :  { %v210_v10 = vpop.eup %209  ;;  %v106_v11 = vsel %vm100_vm6, %v208_v7, 0.0  ;;  %v157_v34 = vadd.f32 %v156_v27, %v155_v22  ;;  %v168_v46 = vand.u32 127, %v52_v0  ;;  %v170_v47 = vmul.u32 128, %v166_v41 }
  0x28   :  { %v212_v13 = vpop.eup %211  ;;  %v105_v14 = vadd.f32 %v104_v9, %v103_v8  ;;  %v108_v17 = vsel %vm100_vm6, %v210_v10, 0.0  ;;  %v162_v48 = vsel %vm100_vm6, %v146_v44, 0.0 }
  0x29   :  { %v214_v19 = vpop.eup %213  ;;  %v110_v21 = vsel %vm100_vm6, %v212_v13, 0.0  ;;  %v159_v42 = vadd.f32 %v158_v37, %v157_v34  ;;  %v173_v49 = vadd.s32 %v170_v47, %v168_v46 }
  0x2a   :  { %v107_v20 = vadd.f32 %v106_v11, %v105_v14  ;;  %v216_v24 = vpop.eup %215  ;;  %v112_v28 = vsel %vm100_vm6, %v214_v19, 0.0 }
  0x2b   :  { %v218_v31 = vpop.eup %217  ;;  %v114_v33 = vsel %vm100_vm6, %v216_v24, 0.0  ;;  %v161_v45 = vadd.f32 %v160_v23, %v159_v42  ;;  %vm174_vm11 = vcmp.lt.s32.totalorder %v173_v49, 8 }
  0x2c   :  { %v109_v25 = vadd.f32 %v108_v17, %v107_v20  ;;  %v116_v38 = vsel %vm100_vm6, %v218_v31, 0.0 }
  0x2d   :  { %v163_v50 = vadd.f32 %v162_v48, %v161_v45 }
  0x2e   :  { %v111_v32 = vadd.f32 %v110_v21, %v109_v25 }
  0x30   :  { %v113_v35 = vadd.f32 %v112_v28, %v111_v32 }
  0x32   :  { %v115_v40 = vadd.f32 %v114_v33, %v113_v35 }
  0x34   :  { %v117_v43 = vadd.f32 %v116_v38, %v115_v40 }
  0x36   :  { %219 = vlog2.f32 %v117_v43 }
  0x3c   :  { %v220_v52 = vpop.eup %219 }
  0x3d   :  { %v119_v29 = vmul.f32 0.6931472, %v220_v52 }
  0x3f   :  { %v164_v51 = vsub.f32 %v119_v29, %v163_v50 }
  0x41   :  { %v175_v53 = vsel %vm174_vm11, %v164_v51, 0.0 }
  0x42   :  { %176 = vst [vmem:[#allocation7] sm:$0x1] %v175_v53 }
  0x43   :  { %187 = dma.vmem_to_hbm [thread:$0]  %s183_s1, 16, %s185_s23, [#allocation4]  }
  0x44   :  { %297 = dma.done.wait [#allocation4], 16  }
  0x45   :  { %298 = vsyncadd [#allocation4], 4294967280 }
  0x46   :  { %192 = vsyncpa [#allocation3], 1 }
  0x47   :  { %193 = vsyncpa [#allocation6], 1 }
  0x48   :  { %194 = vsyncpa [#allocation4], 1 }

</bundles_post_ra>
